<compile_context>
chip_gen: v6e
topology: v6e:2x2x1
jax: 0.10.0
libtpu: 0.0.40
codegen_flags: <defaults>
</compile_context>

<pallas_src>
import functools

import jax
import jax.numpy as jnp
from jax import lax
from jax.experimental import pallas as pl
from jax.experimental.pallas import tpu as pltpu


def _round_up(x, m):
    return ((x + m - 1) // m) * m


def _vmem_cap_bytes():
    try:
        return int(pltpu.get_tpu_info().vmem_capacity_bytes)
    except Exception:
        return 128 << 20


# --------------------------------------------------------------------------
# Prep kernel: f32 adj -> bf16 adj^T + per-node aux columns, one HBM pass.
# --------------------------------------------------------------------------
def _adj_prep_kernel(adj_ref, adjT_ref, aux_ref):
    f32 = jnp.float32
    adj = adj_ref[...]                                   # (N, N) f32, adj[u, v] = w(u->v)
    n = adj.shape[0]
    adjT = jnp.transpose(adj)                            # (N_dst, N_src)
    adjT_ref[...] = adjT.astype(jnp.bfloat16)
    out_deg = jnp.sum((adj != 0).astype(f32), axis=1, keepdims=True)   # (N,1) per src u
    in_deg = jnp.sum((adjT != 0).astype(f32), axis=1, keepdims=True)   # (N,1) per dst v
    ri = lax.broadcasted_iota(jnp.int32, (n, n), 0)
    ci = lax.broadcasted_iota(jnp.int32, (n, n), 1)
    diag = jnp.sum(jnp.where(ri == ci, adj, 0.0), axis=1, keepdims=True)
    aux_ref[...] = jnp.concatenate(
        [lax.rsqrt(jnp.maximum(out_deg, 1.0)),           # src_norm
         lax.rsqrt(jnp.maximum(in_deg, 1.0)),            # dst_norm
         (in_deg > 0).astype(f32),                       # has incoming edge
         diag], axis=1)                                  # self-loop weight


# --------------------------------------------------------------------------
# Main fused kernel: WeightedGraphConv + ReLU + NodeInfoScore + avg/max readout
# --------------------------------------------------------------------------
def _conv_pool_readout_kernel(x_ref, adjT_ref, aux_ref, attn_ref, weight_ref,
                              bias_ref, conv_ref, score_ref, avg_ref, max_ref,
                              attn_scr, *, row_tile, use_bf16_exp):
    f32 = jnp.float32
    bf16 = jnp.bfloat16
    exp_dt = bf16 if use_bf16_exp else f32

    x = x_ref[...]                      # (N, Fi)  f32, zero-padded features
    aux = aux_ref[...]                  # (N, 4)   f32 per-node columns
    src_norm = aux[:, 0:1]              # out_deg.clamp(1) ** -0.5
    dst_norm = aux[:, 1:2]              # in_deg.clamp(1)  ** -0.5
    diag = aux[:, 3:4]                  # self-loop weight adj[v, v]
    w = attn_ref[...]                   # (2, Fi): row0 = attention_W @ a_src, row1 = @ a_dst

    # edge score s[u->v] = leaky_relu(x[u].(W a_src) + x[v].(W a_dst), 0.2)
    # (attention_W folded into the vectors in the wrapper).
    s_src_row = lax.dot_general(w[0:1, :], x, (((1,), (1,)), ((), ())),
                                preferred_element_type=f32)           # (1, N) over src u
    s_src_row = s_src_row.astype(exp_dt)
    neg = jnp.asarray(-1e30, dtype=exp_dt)

    n = x.shape[0]
    n_chunks = n // row_tile

    # edge_softmax over incoming edges of v, then fn.max aggregation:
    # max_u exp(s[v,u] - rowmax[v]) / denom[v] == 1/denom[v]; only the
    # denominator is needed.  Dst-row tiled: only a (row_tile, N) slab of the
    # score/mask/exp intermediates is live at any time.
    def denom_chunk(t, carry):
        r0 = pl.multiple_of(t * row_tile, row_tile)
        adjT_c = adjT_ref[pl.ds(r0, row_tile), :]                     # (T, N) bf16
        x_c = x_ref[pl.ds(r0, row_tile), :]                           # (T, Fi) f32
        aux_c = aux_ref[pl.ds(r0, row_tile), :]                       # (T, 4)
        has_in_c = aux_c[:, 2:3]
        s_dst_c = jnp.sum(x_c * w[1:2, :], axis=1, keepdims=True).astype(exp_dt)
        sc = s_dst_c + s_src_row                                      # (T, N)
        sc = jnp.where(sc > 0, sc, sc * 0.2)                          # leaky_relu(0.2)
        masked = jnp.where(adjT_c != 0, sc, neg)
        row_max = jnp.max(masked, axis=1, keepdims=True)
        p = jnp.exp(masked - row_max)                                 # non-edges -> 0
        denom = jnp.sum(p.astype(f32), axis=1, keepdims=True)         # (T, 1) f32
        attn_scr[pl.ds(r0, row_tile), :] = has_in_c / denom           # 0 for isolated dst
        return carry

    lax.fori_loop(0, n_chunks, denom_chunk, 0)

    node_attn = attn_scr[...]                                         # (N, 1)
    adjT = adjT_ref[...]                                              # (N, N) bf16

    # ---------------- WeightedGraphConv aggregation ----------------
    nfeat = jnp.dot(x * node_attn, weight_ref[...],
                    preferred_element_type=f32)                       # (N, Fo)
    nfeat = nfeat * src_norm
    # u_mul_e('h','e') + sum:  agg[v] = sum_u adj[u, v] * nfeat[u] == adjT @ nfeat
    agg = jnp.dot(adjT, nfeat.astype(bf16), preferred_element_type=f32)
    conv_out = jnp.maximum(agg * dst_norm + bias_ref[...], 0.0)       # F.relu

    # ---------------- NodeInfoScoreLayer (sym_norm=True) ----------------
    # remove_self_loop handled by subtracting the diagonal contribution.
    src_feat = conv_out * src_norm
    dst_feat = (jnp.dot(adjT, src_feat.astype(bf16), preferred_element_type=f32)
                - diag * src_feat) * dst_norm
    score = jnp.sum(jnp.abs(conv_out - dst_feat), axis=1, keepdims=True)  # (N, 1)

    # ---------------- lane-dense stores + per-graph readout ----------------
    conv_ref[...] = conv_out                                          # (N, Fo_pad) full block
    score_ref[...] = score                                            # (N, 1)
    avg_ref[...] = jnp.mean(conv_out, axis=0, keepdims=True)          # (1, Fo_pad)
    max_ref[...] = jnp.max(conv_out, axis=0, keepdims=True)           # (1, Fo_pad)


# --------------------------------------------------------------------------
# Wrapper
# --------------------------------------------------------------------------
def conv_pool_readout(feat, adj, params):
    """ConvPoolReadout(in_feat, out_feat, pool=False) forward.

    feat : (B, N, F_in) float32, adj : (B, N, N) float32 (B independent graphs).
    Returns (out, x_score, readout, perm) — the graph object / e_feat pass
    through unchanged in the pool=False path of the original module.
    """
    f32 = jnp.float32
    feat = feat.astype(f32)
    adj = adj.astype(f32)
    b, n, f_in = feat.shape
    f_out = params["weight"].shape[1]
    fi = _round_up(f_in, 128)
    fo = _round_up(f_out, 128)

    vmem_cap34 = (_vmem_cap_bytes() * 3) // 4     # ~96 MiB v5e/v6e, ~48 MiB v7x

    def blk(*shape):
        return pl.BlockSpec((None,) + shape, lambda i, _s=len(shape): (i,) + (0,) * _s)

    def const(*shape):
        return pl.BlockSpec(shape, lambda i, _s=len(shape): (0,) * _s)

    # ---- prep kernel: adj -> (bf16 adj^T, per-node aux) in one HBM pass ----
    prep_est = 2 * (n * n * 4 + n * n * 2 + n * 16) + 4 * n * n * 4 + (2 << 20)
    adjT, aux = pl.pallas_call(
        _adj_prep_kernel, grid=(b,),
        out_shape=(jax.ShapeDtypeStruct((b, n, n), jnp.bfloat16),
                   jax.ShapeDtypeStruct((b, n, 4), jnp.float32)),
        in_specs=[blk(n, n)],
        out_specs=(blk(n, n), blk(n, 4)),
        compiler_params=pltpu.CompilerParams(
            dimension_semantics=("parallel",),
            vmem_limit_bytes=int(min(max(prep_est, 16 << 20), vmem_cap34))),
    )(adj)

    # ---- fold attention_W into the attention vectors, zero-pad to lane width ----
    W = params["attention_W"].astype(f32)
    a = params["attention_a"].astype(f32)
    w_src = (W @ a[:f_in, :])[:, 0]               # (F_in,)   acts on x[src]
    w_dst = (W @ a[f_in:, :])[:, 0]               # (F_in,)   acts on x[dst]
    attn_vecs = (jnp.zeros((2, fi), f32)
                 .at[0, :f_in].set(w_src)
                 .at[1, :f_in].set(w_dst))
    weight = jnp.zeros((fi, fo), f32).at[:f_in, :f_out].set(params["weight"].astype(f32))
    bias = jnp.zeros((1, fo), f32).at[0, :f_out].set(params["bias"].astype(f32))
    x = feat if fi == f_in else jnp.pad(feat, ((0, 0), (0, 0), (0, fi - f_in)))

    # Dst-row tile for the N^2 softmax-denominator slab.
    row_tile = n
    if n > 512:
        for t in (512, 256, 128, 64):
            if n % t == 0:
                row_tile = t
                break

    kind = jax.devices()[0].device_kind.lower()
    use_bf16_exp = ("v6" in kind) or ("v7" in kind)   # v5e has no bf16 VPU/EUP

    # VMEM budget: double-buffered per-graph tiles + resident params +
    # row-tiled exp slabs + (N, F) f32 temporaries.
    tile_bytes = (n * n * 2 + n * fi * 4 + n * 16
                  + n * fo * 4 + n * 4 + 8 * fo)
    param_bytes = (2 * fi + fi * fo + fo) * 4
    exp_item = 2 if use_bf16_exp else 4
    est = (2 * tile_bytes + param_bytes
           + 4 * row_tile * n * exp_item
           + 6 * n * fo * 4 + n * fi * 4
           + (2 << 20))
    vmem_limit = int(min(max(est, 16 << 20), vmem_cap34))

    cost = pl.CostEstimate(
        flops=int(b * (4 * n * fi + 2 * n * fi * fo + 4 * n * n * fo
                       + 8 * n * n + 10 * n * fo)),
        transcendentals=int(b * n * n),
        bytes_accessed=int(b * tile_bytes + param_bytes))

    kernel = functools.partial(_conv_pool_readout_kernel,
                               row_tile=row_tile, use_bf16_exp=use_bf16_exp)

    conv, score, avg_r, max_r = pl.pallas_call(
        kernel, grid=(b,),
        out_shape=(jax.ShapeDtypeStruct((b, n, fo), jnp.float32),
                   jax.ShapeDtypeStruct((b, n, 1), jnp.float32),
                   jax.ShapeDtypeStruct((b, 1, fo), jnp.float32),
                   jax.ShapeDtypeStruct((b, 1, fo), jnp.float32)),
        in_specs=[blk(n, fi),        # feat (zero-padded)
                  blk(n, n),         # adjT (bf16)
                  blk(n, 4),         # per-node aux columns
                  const(2, fi),      # folded attention vectors (resident)
                  const(fi, fo),     # weight (resident)
                  const(1, fo)],     # bias (resident)
        out_specs=(blk(n, fo), blk(n, 1), blk(1, fo), blk(1, fo)),
        scratch_shapes=[pltpu.VMEM((n, 1), jnp.float32)],   # node_attn = 1/denom
        compiler_params=pltpu.CompilerParams(
            dimension_semantics=("parallel",),
            vmem_limit_bytes=vmem_limit),
        cost_estimate=cost,
    )(x, adjT, aux, attn_vecs, weight, bias)

    out = conv[:, :, :f_out]
    x_score = score[:, :, 0]
    readout = jnp.concatenate([avg_r[:, 0, :f_out], max_r[:, 0, :f_out]], axis=-1)
    perm = jnp.broadcast_to(jnp.arange(n, dtype=jnp.int32), (b, n))
    return out, x_score, readout, perm


def _xavier_normal(key, shape):
    fan_in, fan_out = shape[0], shape[1]
    std = (2.0 / (fan_in + fan_out)) ** 0.5
    return std * jax.random.normal(key, shape, dtype=jnp.float32)


def init_params(key, in_feat, out_feat):
    k1, k2, k3 = jax.random.split(key, 3)
    return {
        "attention_W": _xavier_normal(k1, (in_feat, in_feat)),
        "attention_a": _xavier_normal(k2, (2 * in_feat, 1)),
        "weight": _xavier_normal(k3, (in_feat, out_feat)),
        "bias": jnp.zeros((out_feat,), jnp.float32),
    }


if __name__ == "__main__":
    key = jax.random.PRNGKey(0)
    k_feat, k_param = jax.random.split(key)

    B, N, IN_FEAT, OUT_FEAT = 2, 128, 16, 32

    # Two deterministic directed graphs, no self-loops, every node has
    # in-degree 2 and out-degree 2 (different ring offsets per graph).
    idx = jnp.arange(N)

    def ring_adj(offsets):
        a = jnp.zeros((N, N), jnp.float32)
        for off in offsets:
            a = a.at[idx, (idx + off) % N].set(1.0)   # e_feat = 1.0
        return a

    adj = jnp.stack([ring_adj((1, 3)), ring_adj((2, 5))])          # (B, N, N)
    feat = jax.random.normal(k_feat, (B, N, IN_FEAT), dtype=jnp.float32)
    params = init_params(k_param, IN_FEAT, OUT_FEAT)

    out, x_score, readout, perm = conv_pool_readout(feat, adj, params)
    jax.block_until_ready((out, x_score, readout, perm))

    assert out.shape == (B, N, OUT_FEAT)
    assert x_score.shape == (B, N)
    assert readout.shape == (B, 2 * OUT_FEAT)
    assert perm.shape == (B, N)
    assert bool(jnp.all(jnp.isfinite(out)))
    assert bool(jnp.all(jnp.isfinite(x_score)))
    assert bool(jnp.all(jnp.isfinite(readout)))
    print("KERNEL_OK")
</pallas_src>

<mosaic_0001>
module attributes {stable_mosaic.version = 11 : i64} {
  func.func @_adj_prep_kernel(%arg0: i32, %arg1: memref<1x128x128xf32, #tpu.memory_space<vmem>>, %arg2: memref<1x128x128xbf16, #tpu.memory_space<vmem>>, %arg3: memref<1x128x4xf32, #tpu.memory_space<vmem>>) attributes {dimension_semantics = [#tpu.dimension_semantics<parallel>], iteration_bounds = array<i64: 2>, scalar_prefetch = 0 : i64, scratch_operands = 0 : i64, tpu.core_type = #tpu.core_type<tc>, window_params = [{transform_indices = @transform_0, window_bounds = array<i64: 1, 128, 128>}, {transform_indices = @transform_1, window_bounds = array<i64: 1, 128, 128>}, {transform_indices = @transform_2, window_bounds = array<i64: 1, 128, 4>}]} {
    %c0 = arith.constant 0 : index
    %c0_0 = arith.constant 0 : index
    %c0_1 = arith.constant 0 : index
    %0 = vector.load %arg1[%c0, %c0_0, %c0_1] : memref<1x128x128xf32, #tpu.memory_space<vmem>>, vector<1x128x128xf32>
    %1 = vector.shape_cast %0 : vector<1x128x128xf32> to vector<128x128xf32>
    %2 = tpu.transpose %1, [1, 0] : vector<128x128xf32> -> vector<128x128xf32>
    %3 = arith.truncf %2 : vector<128x128xf32> to vector<128x128xbf16>
    %c0_2 = arith.constant 0 : index
    %c0_3 = arith.constant 0 : index
    %c0_4 = arith.constant 0 : index
    %4 = vector.load %arg2[%c0_2, %c0_3, %c0_4] : memref<1x128x128xbf16, #tpu.memory_space<vmem>>, vector<1x128x128xbf16>
    %5 = vector.shape_cast %4 : vector<1x128x128xbf16> to vector<128x128xbf16>
    %6 = vector.shape_cast %3 : vector<128x128xbf16> to vector<1x128x128xbf16>
    tpu.vector_store %arg2[%c0_2, %c0_3, %c0_4], %6 {strides = array<i32>} : memref<1x128x128xbf16, #tpu.memory_space<vmem>>, vector<1x128x128xbf16>,
    %cst = arith.constant 0.000000e+00 : f32
    %7 = vector.broadcast %cst : f32 to vector<128x128xf32>
    %8 = arith.cmpf one, %1, %7 : vector<128x128xf32>
    %9 = arith.extui %8 : vector<128x128xi1> to vector<128x128xi32>
    %10 = arith.sitofp %9 : vector<128x128xi32> to vector<128x128xf32>
    %cst_5 = arith.constant dense<0.000000e+00> : vector<128xf32>
    %11 = vector.multi_reduction <add>, %10, %cst_5 [1] : vector<128x128xf32> to vector<128xf32>
    %12 = vector.shape_cast %11 : vector<128xf32> to vector<128x1xf32>
    %cst_6 = arith.constant 0.000000e+00 : f32
    %13 = vector.broadcast %cst_6 : f32 to vector<128x128xf32>
    %14 = arith.cmpf one, %2, %13 : vector<128x128xf32>
    %15 = arith.extui %14 : vector<128x128xi1> to vector<128x128xi32>
    %16 = arith.sitofp %15 : vector<128x128xi32> to vector<128x128xf32>
    %cst_7 = arith.constant dense<0.000000e+00> : vector<128xf32>
    %17 = vector.multi_reduction <add>, %16, %cst_7 [1] : vector<128x128xf32> to vector<128xf32>
    %18 = vector.shape_cast %17 : vector<128xf32> to vector<128x1xf32>
    %19 = tpu.iota {dimensions = array<i32: 0>} : vector<128x128xi32>
    %20 = tpu.iota {dimensions = array<i32: 1>} : vector<128x128xi32>
    %21 = arith.cmpi eq, %19, %20 : vector<128x128xi32>
    %cst_8 = arith.constant 0.000000e+00 : f32
    %22 = vector.broadcast %cst_8 : f32 to vector<128x128xf32>
    %23 = arith.select %21, %1, %22 : vector<128x128xi1>, vector<128x128xf32>
    %cst_9 = arith.constant dense<0.000000e+00> : vector<128xf32>
    %24 = vector.multi_reduction <add>, %23, %cst_9 [1] : vector<128x128xf32> to vector<128xf32>
    %25 = vector.shape_cast %24 : vector<128xf32> to vector<128x1xf32>
    %cst_10 = arith.constant 1.000000e+00 : f32
    %26 = vector.broadcast %cst_10 : f32 to vector<128x1xf32>
    %27 = arith.maximumf %12, %26 : vector<128x1xf32>
    %28 = math.rsqrt %27 : vector<128x1xf32>
    %cst_11 = arith.constant 1.000000e+00 : f32
    %29 = vector.broadcast %cst_11 : f32 to vector<128x1xf32>
    %30 = arith.maximumf %18, %29 : vector<128x1xf32>
    %31 = math.rsqrt %30 : vector<128x1xf32>
    %cst_12 = arith.constant 0.000000e+00 : f32
    %32 = vector.broadcast %cst_12 : f32 to vector<128x1xf32>
    %33 = arith.cmpf ogt, %18, %32 : vector<128x1xf32>
    %34 = arith.extui %33 : vector<128x1xi1> to vector<128x1xi32>
    %35 = arith.sitofp %34 : vector<128x1xi32> to vector<128x1xf32>
    %36 = tpu.concatenate %28, %31, %35, %25 in 1 : vector<128x1xf32>, vector<128x1xf32>, vector<128x1xf32>, vector<128x1xf32> -> vector<128x4xf32>
    %c0_13 = arith.constant 0 : index
    %c0_14 = arith.constant 0 : index
    %c0_15 = arith.constant 0 : index
    %37 = vector.load %arg3[%c0_13, %c0_14, %c0_15] : memref<1x128x4xf32, #tpu.memory_space<vmem>>, vector<1x128x4xf32>
    %38 = vector.shape_cast %37 : vector<1x128x4xf32> to vector<128x4xf32>
    %39 = vector.shape_cast %36 : vector<128x4xf32> to vector<1x128x4xf32>
    tpu.vector_store %arg3[%c0_13, %c0_14, %c0_15], %39 {strides = array<i32>} : memref<1x128x4xf32, #tpu.memory_space<vmem>>, vector<1x128x4xf32>,
    return
  }
  func.func @transform_0(%arg0: i32) -> (i32, i32, i32) {
    %c0_i32 = arith.constant 0 : i32
    %c0_i32_0 = arith.constant 0 : i32
    %c0_i32_1 = arith.constant 0 : i32
    return %arg0, %c0_i32, %c0_i32_0 : i32, i32, i32
  }
  func.func @transform_1(%arg0: i32) -> (i32, i32, i32) {
    %c0_i32 = arith.constant 0 : i32
    %c0_i32_0 = arith.constant 0 : i32
    %c0_i32_1 = arith.constant 0 : i32
    return %arg0, %c0_i32, %c0_i32_0 : i32, i32, i32
  }
  func.func @transform_2(%arg0: i32) -> (i32, i32, i32) {
    %c0_i32 = arith.constant 0 : i32
    %c0_i32_0 = arith.constant 0 : i32
    %c0_i32_1 = arith.constant 0 : i32
    return %arg0, %c0_i32, %c0_i32_0 : i32, i32, i32
  }
}

</mosaic_0001>

<bundles_post_ra>
// kernel: tpu_custom_call.1
= control target key start
LH: loop header
LB: loop body
LE: loop exit
PB: predicated region body
PF: predicated region fallthrough
CT: control target
= control target key end

     0   :  { %8 = vsyncpa [#allocation3], 0  ;;  %s1758_s0 = inlined_call_operand.hbm [shape: f32[2,128,128], index: 0, kind: input, shape index: {}]   ;;  %s1759_s1 = inlined_call_operand.hbm [shape: bf16[2,128,128], index: 1, kind: output, shape index: {0}]   ;;  %s1760_s2 = inlined_call_operand.vmem [shape: f32[2,128,4], index: 2, kind: output, shape index: {1}]  }
   0x1   :  { %10 = vsyncpa [#allocation3 + $0x1], 0 }
   0x2   :  { %11 = vsyncpa [#allocation4], 0 }
   0x3   :  { %13 = vsyncpa [#allocation4 + $0x1], 0  ;;  %s1223_s9 = smov 0   ;;  %s1225_s10 = smov 0  }
   0x4   :  { %s1227_s11 = smov 0   ;;  %s1229_s12 = smov 0  }
   0x5 LB: > { %s1244_s13 = sadd.s32 4294967295, %s1199_s12   ;;  %s846_s14 = sadd.s32 4294967294, %s1199_s12   ;;  %s1199_s12 = sphi %s1229_s12, %s1775_s12   ;;  %s1195_s11 = sphi %s1227_s11, %s1774_s11   ;;  %s1191_s10 = sphi %s1225_s10, %s1773_s10   ;;  %s1187_s9 = sphi %s1223_s9, %s1772_s9  }
   0x6   : > { %s1248_s15 = sadd.s32 1, %s1199_s12   ;;  %s26_s16 = sadd.s32 1, %s1195_s11 }
   0x7   : > { %s23_s17 = ssub.s32 %s1199_s12, %s1248_s15  ;;  %p33_p0 = scmp.ne.s32.totalorder %s1195_s11, %s1191_s10 }
   0x8   : > { %p24_p1 = scmp.eq.s32.totalorder %s23_s17, 0  ;;  %p34_p2 = scmp.eq.s32.totalorder %s1199_s12, 0 }
   0x9   : > { %p39_p3 = scmp.ne.s32.totalorder %s1191_s10, %s1187_s9  ;;  %p40_p4 = scmp.eq.s32.totalorder %s1244_s13, 0 }
   0xa   : > { %s1260_s18 = scalar_select %p24_p1, %s1195_s11, %s26_s16  }
   0xb   : > { %p1262_p5 = por %p34_p2, %p33_p0  ;;  %p1266_p6 = por %p40_p4, %p39_p3 }
   0xc   : > { %p63_p7 = scmp.eq.s32.totalorder %s1244_s13, 1  ;;  %p69_p8 = scmp.eq.s32.totalorder %s846_s14, 1 }
   0xd   : > { %s1764_s20 = scalar_select %p1266_p6, 1, 0 }
   0xe   : > { %p1004_p10 = scmp.lt.s32.totalorder %s1199_s12, 2  ;;  %p1273_p11 = por %p63_p7, %p33_p0 }
   0xf   : > { %p1277_p12 = por %p69_p8, %p39_p3  ;;  %s115_s23 = sand.u32 1, %s1195_s11  }
  0x10   : > { %s1765_s21 = scalar_select %p1273_p11, 1, 0 }
  0x11   : > { %s1766_s22 = scalar_select %p1277_p12, 1, 0 }
  0x12   : > { %s926_s24 = sshll.u32 %s1199_s12, 11  ;;  %s849_s25 = sshll.u32 %s115_s23, 7 }
  0x13   : > { %s1286_s28 = scalar_lea.hbm %s1758_s0, %s926_s24  ;;  %s119_s29 = scalar_lea.vmem [#allocation2], %s849_s25 }
  0x14   : > { %s126_s30 = sshll.u32 %s119_s29, 4  ;;  %p1290_p13 = pnand %p1004_p10, %p1262_p5  ;;  %s1294_s30 = int_to_ptr.vmem [resolvable:$true] %s126_s30 }
  0x15   : > { %s1296_s4 = scalar_lea.sflag [#allocation3], %s115_s23  ;;  %s1107_s5 = scalar_lea.hbm %s1286_s28, 2048 }
  0x16   : > { %p1108_p0 = scmp.ne.s32.totalorder %s1286_s28, %s1107_s5  ;;  %p1109_p1 = pneg %p1290_p13 }
  0x17   : > { %s1112_s8 = scalar_lea.hbm %s1758_s0, 4096  ;;  %p1113_p4 = scmp.lt.s32.totalorder %s1286_s28, %s1758_s0 }
  0x18   : > { %p1110_p2 = pnand %p1109_p1, %p1108_p0  ;;  %p1114_p5 = scmp.lt.s32.totalorder %s1112_s8, %s1107_s5 }
  0x1a   : > { %p1111_p3 = pneg %p1110_p2  ;;  %p1115_p7 = por %p1114_p5, %p1113_p4 }
  0x1c   : > { %p1116_p8 = pnand %p1115_p7, %p1111_p3 }
  0x1e   : > { %1119 = shalt.err (!%p1116_p8)
}
  0x1f   : > { %s1120_s17 = scalar_lea.vmem %s1294_s30, 2048  ;;  %s1201_s19 = smov [#allocation2]  }
  0x20   : > { %p1121_p10 = scmp.ne.s32.totalorder %s1294_s30, %s1120_s17  ;;  %s1125_s23 = sshll.u32 %s1201_s19, 4  ;;  %s1126_s23 = int_to_ptr.vmem [resolvable:$false] %s1125_s23 }
  0x21   : > { %s1127_s24 = scalar_lea.vmem %s1126_s23, 4096  ;;  %p1128_p2 = scmp.lt.s32.totalorder %s1294_s30, %s1126_s23 }
  0x22   : > { %p1123_p9 = pnand %p1121_p10, %p1109_p1  ;;  %p1129_p12 = scmp.lt.s32.totalorder %s1127_s24, %s1120_s17 }
  0x24   : > { %p1124_p0 = pneg %p1123_p9  ;;  %p1130_p11 = por %p1129_p12, %p1128_p2 }
  0x26   : > { %p1131_p6 = pnand %p1130_p11, %p1124_p0 }
  0x28   : > { %1134 = shalt.err (!%p1131_p6)
}
  0x29   : > { %s1202_s25 = smov 128   ;;  %s1203_s26 = smov 8  }
  0x2a   : > { %999 = dma.hbm_to_vmem [thread:$0]  (!%p1290_p13), %s1286_s28, 2048, %s1294_s30, %s1296_s4, %s1202_s25, %s1202_s25, %s1203_s26  }
  0x2b   : > { %p852_p9 = scmp.ge.s32.totalorder %s1199_s12, 1  ;;  %p134_p1 = scmp.lt.s32.totalorder %s1199_s12, 3 }
  0x2d   : > { %p135_p3 = pnand %p852_p9, %p134_p1 }
  0x2e   : > { %s1320_s27 = sand.u32 (!%p135_p3), 1, %s1191_s10   ;;  %p1768_p6 = scmp.ne.s32.totalorder (!%p135_p3), %s1764_s20, 0 }
  0x2f   : > { %138 = sbr.rel (%p135_p3) target bundleno = 401 (0x191), region = 24  ;;  %s853_s29 = sshll.u32 (!%p135_p3), %s1320_s27, 7 }
  0x30   : > { %s141_s5 = scalar_lea.sflag (!%p135_p3), [#allocation3], %s1320_s27  ;;  %s1324_s6 = scalar_lea.vmem (!%p135_p3), [#allocation2], %s853_s29 }
  0x34   : > { %1178 = dma.done.wait (%p1768_p6), %s141_s5, 2048  }
  0x35   : > { %1180 = vsyncadd (%p1768_p6), %s141_s5, 4294965248  ;;  %v1331_v0 = vld [vmem:[%s1324_s6] sm:$0xff]  ;;  %v1334_v1 = vld [vmem:[%s1324_s6 + $0x8] sm:$0xff]  ;;  %v1204_v2 = vmov 0.0   ;;  %v463_v30 = vlaneseq  ;;  %s854_s20 = sshll.u32 %s1320_s27, 6  ;;  %s944_s3 = sshll.u32 %s1244_s13, 10 }
  0x36   : > { %191 = vxpose.xlu0.b32.start [1/16] %v1331_v0, 128  ;;  %vm303_vm0 = vcmp.ne.f32.partialorder %v1331_v0, 0.0  ;;  %vm304_vm1 = vcmp.ne.f32.partialorder %v1334_v1, 0.0  ;;  %v1341_v4 = vld [vmem:[%s1324_s6 + $0x10] sm:$0xff]  ;;  %v1347_v6 = vld [vmem:[%s1324_s6 + $0x18] sm:$0xff]  ;;  %v1353_v8 = vld [vmem:[%s1324_s6 + $0x20] sm:$0xff]  ;;  %s1451_s28 = scalar_lea.vmem [#allocation5], %s854_s20  ;;  %s1534_s8 = scalar_lea.hbm %s1759_s1, %s944_s3 }
  0x37   : > { %v873_v3 = vsel %vm303_vm0, 1.0, %v1204_v2  ;;  %v874_v5 = vsel %vm304_vm1, 1.0, %v1204_v2  ;;  %vm305_vm2 = vcmp.ne.f32.partialorder %v1341_v4, 0.0  ;;  %vm306_vm3 = vcmp.ne.f32.partialorder %v1347_v6, 0.0  ;;  %v1359_v10 = vld [vmem:[%s1324_s6 + $0x28] sm:$0xff]  ;;  %v1365_v12 = vld [vmem:[%s1324_s6 + $0x30] sm:$0xff] }
  0x38   : > { %351 = vadd.xlane.f32.xlu1 %v873_v3  ;;  %v875_v7 = vsel %vm305_vm2, 1.0, %v1204_v2  ;;  %v876_v9 = vsel %vm306_vm3, 1.0, %v1204_v2  ;;  %vm307_vm4 = vcmp.ne.f32.partialorder %v1353_v8, 0.0  ;;  %vm308_vm5 = vcmp.ne.f32.partialorder %v1359_v10, 0.0  ;;  %v1371_v14 = vld [vmem:[%s1324_s6 + $0x38] sm:$0xff]  ;;  %v1377_v16 = vld [vmem:[%s1324_s6 + $0x40] sm:$0xff] }
  0x39   : > { %v877_v11 = vsel %vm307_vm4, 1.0, %v1204_v2  ;;  %v878_v13 = vsel %vm308_vm5, 1.0, %v1204_v2  ;;  %vm309_vm6 = vcmp.ne.f32.partialorder %v1365_v12, 0.0  ;;  %vm310_vm7 = vcmp.ne.f32.partialorder %v1371_v14, 0.0  ;;  %v1383_v18 = vld [vmem:[%s1324_s6 + $0x48] sm:$0xff]  ;;  %v1389_v20 = vld [vmem:[%s1324_s6 + $0x50] sm:$0xff] }
  0x3a   : > { %192 = vxpose.xlu0.b32.cont [2/16] %v1334_v1, 128  ;;  %v879_v15 = vsel %vm309_vm6, 1.0, %v1204_v2  ;;  %v880_v17 = vsel %vm310_vm7, 1.0, %v1204_v2  ;;  %vm311_vm8 = vcmp.ne.f32.partialorder %v1377_v16, 0.0  ;;  %vm312_vm9 = vcmp.ne.f32.partialorder %v1383_v18, 0.0  ;;  %v1395_v22 = vld [vmem:[%s1324_s6 + $0x58] sm:$0xff]  ;;  %v1401_v24 = vld [vmem:[%s1324_s6 + $0x60] sm:$0xff] }
  0x3b   : > { %v881_v19 = vsel %vm311_vm8, 1.0, %v1204_v2  ;;  %v882_v21 = vsel %vm312_vm9, 1.0, %v1204_v2  ;;  %vm313_vm10 = vcmp.ne.f32.partialorder %v1389_v20, 0.0  ;;  %vm314_vm11 = vcmp.ne.f32.partialorder %v1395_v22, 0.0  ;;  %v1407_v26 = vld [vmem:[%s1324_s6 + $0x68] sm:$0xff]  ;;  %v1413_v28 = vld [vmem:[%s1324_s6 + $0x70] sm:$0xff] }
  0x3c   : > { %353 = vadd.xlane.f32.xlu1 %v874_v5  ;;  %v883_v23 = vsel %vm313_vm10, 1.0, %v1204_v2  ;;  %v884_v25 = vsel %vm314_vm11, 1.0, %v1204_v2  ;;  %vm315_vm12 = vcmp.ne.f32.partialorder %v1401_v24, 0.0  ;;  %vm316_vm13 = vcmp.ne.f32.partialorder %v1407_v26, 0.0  ;;  %v1419_v31 = vld [vmem:[%s1324_s6 + $0x78] sm:$0xff]  ;;  %s745_s30 = sshll.u32 %s1451_s28, 4  ;;  %s1528_s30 = int_to_ptr.vmem [resolvable:$true] %s745_s30 }
  0x3d   : > { %v885_v27 = vsel %vm315_vm12, 1.0, %v1204_v2  ;;  %v886_v29 = vsel %vm316_vm13, 1.0, %v1204_v2  ;;  %vm317_vm14 = vcmp.ne.f32.partialorder %v1413_v28, 0.0  ;;  %vm318_vm15 = vcmp.ne.f32.partialorder %v1419_v31, 0.0  ;;  %s727_s14 = scalar_lea.sflag [#allocation4], %s1320_s27  ;;  %s1135_s16 = scalar_lea.vmem %s1528_s30, 1024 }
  0x3e   : > { %193 = vxpose.xlu0.b32.cont [3/16] %v1341_v4, 128  ;;  %v887_v32 = vsel %vm317_vm14, 1.0, %v1204_v2  ;;  %v1424_v33 = vshrl.u32 %v463_v30, 7  ;;  %v1426_v34 = vand.u32 127, %v463_v30  ;;  %v888_v35 = vsel %vm318_vm15, 1.0, %v1204_v2  ;;  %p1136_p11 = scmp.ne.s32.totalorder %s1528_s30, %s1135_s16  ;;  %p1769_p12 = scmp.ne.s32.totalorder %s1765_s21, 0 }
  0x3f   : > { %s1205_s17 = smov [#allocation5]  }
  0x40   : > { %355 = vadd.xlane.f32.xlu1 %v875_v7  ;;  %vm482_vm0 = vcmp.eq.s32.totalorder %v1424_v33, %v1426_v34  ;;  %v466_v36 = vadd.s32 16, %v1424_v33  ;;  %v468_v38 = vadd.s32 32, %v1424_v33  ;;  %v465_v41 = vadd.s32 8, %v1424_v33  ;;  %p1137_p13 = pnand %p1136_p11, %p1769_p12  ;;  %s1139_s19 = sshll.u32 %s1205_s17, 4  ;;  %s1140_s19 = int_to_ptr.vmem [resolvable:$false] %s1139_s19 }
  0x41   : > { %v498_v37 = vsel %vm482_vm0, %v1331_v0, 0.0  ;;  %v467_v42 = vadd.s32 24, %v1424_v33  ;;  %v469_v44 = vadd.s32 40, %v1424_v33  ;;  %s1141_s23 = scalar_lea.vmem %s1140_s19, 2048  ;;  %p1142_p5 = scmp.lt.s32.totalorder %s1528_s30, %s1140_s19 }
  0x42   : > { %194 = vxpose.xlu0.b32.cont [4/16] %v1347_v6, 128  ;;  %vm484_vm1 = vcmp.eq.s32.totalorder %v466_v36, %v1426_v34  ;;  %vm486_vm2 = vcmp.eq.s32.totalorder %v468_v38, %v1426_v34  ;;  %vm483_vm3 = vcmp.eq.s32.totalorder %v465_v41, %v1426_v34  ;;  %v471_v38 = vadd.s32 56, %v1424_v33  ;;  %p1138_p4 = pneg %p1137_p13  ;;  %p1143_p7 = scmp.lt.s32.totalorder %s1141_s23, %s1135_s16 }
  0x43   : > { %v500_v39 = vsel %vm484_vm1, %v1341_v4, 0.0  ;;  %v502_v40 = vsel %vm486_vm2, %v1353_v8, 0.0  ;;  %v499_v43 = vsel %vm483_vm3, %v1334_v1, 0.0  ;;  %vm485_vm4 = vcmp.eq.s32.totalorder %v467_v42, %v1426_v34 }
  0x44   : > { %357 = vadd.xlane.f32.xlu1 %v876_v9  ;;  %v501_v45 = vsel %vm485_vm4, %v1347_v6, 0.0  ;;  %vm487_vm5 = vcmp.eq.s32.totalorder %v469_v44, %v1426_v34  ;;  %p1144_p8 = por %p1143_p7, %p1142_p5 }
  0x45   : > { %v503_v46 = vsel %vm487_vm5, %v1359_v10, 0.0 }
  0x46   : > { %195 = vxpose.xlu0.b32.cont [5/16] %v1353_v8, 128  ;;  %p1145_p10 = pnand %p1144_p8, %p1138_p4 }
  0x48   : > { %359 = vadd.xlane.f32.xlu1 %v877_v11 }
  0x4a   : > { %196 = vxpose.xlu0.b32.cont [6/16] %v1359_v10, 128 }
  0x4c   : > { %361 = vadd.xlane.f32.xlu1 %v878_v13 }
  0x4e   : > { %197 = vxpose.xlu0.b32.cont [7/16] %v1365_v12, 128 }
  0x50   : > { %363 = vadd.xlane.f32.xlu1 %v879_v15 }
  0x52   : > { %198 = vxpose.xlu0.b32.cont [8/16] %v1371_v14, 128 }
  0x54   : > { %365 = vadd.xlane.f32.xlu1 %v880_v17 }
  0x56   : > { %199 = vxpose.xlu0.b32.cont [9/16] %v1377_v16, 128 }
  0x58   : > { %367 = vadd.xlane.f32.xlu1 %v881_v19 }
  0x5a   : > { %200 = vxpose.xlu0.b32.cont [10/16] %v1383_v18, 128 }
  0x5c   : > { %369 = vadd.xlane.f32.xlu1 %v882_v21 }
  0x5e   : > { %201 = vxpose.xlu0.b32.cont [11/16] %v1389_v20, 128 }
  0x60   : > { %371 = vadd.xlane.f32.xlu1 %v883_v23 }
  0x62   : > { %202 = vxpose.xlu0.b32.cont [12/16] %v1395_v22, 128 }
  0x64   : > { %373 = vadd.xlane.f32.xlu1 %v884_v25 }
  0x66   : > { %203 = vxpose.xlu0.b32.cont [13/16] %v1401_v24, 128 }
  0x68   : > { %375 = vadd.xlane.f32.xlu1 %v885_v27 }
  0x6a   : > { %204 = vxpose.xlu0.b32.cont [14/16] %v1407_v26, 128 }
  0x6c   : > { %377 = vadd.xlane.f32.xlu1 %v886_v29 }
  0x6e   : > { %205 = vxpose.xlu0.b32.cont [15/16] %v1413_v28, 128 }
  0x70   : > { %379 = vadd.xlane.f32.xlu1 %v887_v32  ;;  %v470_v32 = vadd.s32 48, %v1424_v33 }
  0x72   : > { %206 = vxpose.xlu0.b32.end [16/16] %v1419_v31, 128  ;;  %vm488_vm5 = vcmp.eq.s32.totalorder %v470_v32, %v1426_v34 }
  0x73   : > { %v504_v42 = vsel %vm488_vm5, %v1365_v12, 0.0 }
  0x74   : > { %381 = vadd.xlane.f32.xlu1 %v888_v35 }
  0x78   : > { %514 = vadd.xlane.f32.xlu1 %v498_v37 }
  0x7c   : > { %518 = vadd.xlane.f32.xlu1 %v500_v39  ;;  %v472_v39 = vadd.s32 64, %v1424_v33 }
  0x80   : > { %522 = vadd.xlane.f32.xlu1 %v502_v40 }
  0x9f   : > { %516 = vadd.xlane.f32.xlu0 %v499_v43 }
  0xa3   : > { %520 = vadd.xlane.f32.xlu0 %v501_v45  ;;  %v473_v45 = vadd.s32 72, %v1424_v33 }
  0xa7   : > { %524 = vadd.xlane.f32.xlu0 %v503_v46  ;;  %v474_v46 = vadd.s32 80, %v1424_v33 }
  0xb2   : > { %v207_v47 = vpop.trf.xlu0 }
  0xb3   : > { %vm383_vm6 = vcmp.ne.f32.partialorder %v207_v47, 0.0 }
  0xb4   : > { %v889_v48 = vsel %vm383_vm6, 1.0, %v1204_v2  ;;  %vm489_vm6 = vcmp.eq.s32.totalorder %v471_v38, %v1426_v34 }
  0xb5   : > { %431 = vadd.xlane.f32.xlu0 %v889_v48  ;;  %v505_v48 = vsel %vm489_vm6, %v1371_v14, 0.0  ;;  %v477_v14 = vadd.s32 104, %v1424_v33 }
  0xb6   : > { %v208_v49 = vpop.trf.xlu0 }
  0xb7   : > { %v948_v50 = vpack.c.bf16 %v208_v49, %v207_v47  ;;  %vm384_vm7 = vcmp.ne.f32.partialorder %v208_v49, 0.0  ;;  %v475_v49 = vadd.s32 88, %v1424_v33 }
  0xb8   : > { %v890_v51 = vsel %vm384_vm7, 1.0, %v1204_v2  ;;  %vm490_vm7 = vcmp.eq.s32.totalorder %v472_v39, %v1426_v34 }
  0xb9   : > { %949 = vst [vmem:[%s1451_s28] sm:$0xff] %v948_v50   ;;  %433 = vadd.xlane.f32.xlu1 %v890_v51  ;;  %v506_v12 = vsel %vm490_vm7, %v1377_v16, 0.0  ;;  %v476_v50 = vadd.s32 96, %v1424_v33  ;;  %v478_v16 = vadd.s32 112, %v1424_v33 }
  0xba   : > { %v209_v52 = vpop.trf.xlu0 }
  0xbb   : > { %vm385_vm8 = vcmp.ne.f32.partialorder %v209_v52, 0.0 }
  0xbc   : > { %v891_v53 = vsel %vm385_vm8, 1.0, %v1204_v2 }
  0xbd   : > { %435 = vadd.xlane.f32.xlu1 %v891_v53 }
  0xbe   : > { %v210_v54 = vpop.trf.xlu0 }
  0xbf   : > { %v953_v55 = vpack.c.bf16 %v210_v54, %v209_v52  ;;  %vm386_vm9 = vcmp.ne.f32.partialorder %v210_v54, 0.0 }
  0xc0   : > { %v892_v56 = vsel %vm386_vm9, 1.0, %v1204_v2  ;;  %vm491_vm9 = vcmp.eq.s32.totalorder %v473_v45, %v1426_v34 }
  0xc1   : > { %985 = vst [vmem:[%s1451_s28 + $0x8] sm:$0xff] %v953_v55   ;;  %437 = vadd.xlane.f32.xlu1 %v892_v56  ;;  %v1462_v4 = vpop.xlane.xlu1 %351  ;;  %v507_v52 = vsel %vm491_vm9, %v1383_v18, 0.0  ;;  %v479_v18 = vadd.s32 120, %v1424_v33 }
  0xc2   : > { %v211_v57 = vpop.trf.xlu0 }
  0xc3   : > { %vm387_vm10 = vcmp.ne.f32.partialorder %v211_v57, 0.0 }
  0xc4   : > { %v893_v58 = vsel %vm387_vm10, 1.0, %v1204_v2  ;;  %vm492_vm10 = vcmp.eq.s32.totalorder %v474_v46, %v1426_v34 }
  0xc5   : > { %439 = vadd.xlane.f32.xlu1 %v893_v58  ;;  %v1466_v8 = vpop.xlane.xlu1 %353  ;;  %v508_v53 = vsel %vm492_vm10, %v1389_v20, 0.0 }
  0xc6   : > { %v212_v59 = vpop.trf.xlu0 }
  0xc7   : > { %v958_v60 = vpack.c.bf16 %v212_v59, %v211_v57  ;;  %vm388_vm11 = vcmp.ne.f32.partialorder %v212_v59, 0.0 }
  0xc8   : > { %v894_v61 = vsel %vm388_vm11, 1.0, %v1204_v2  ;;  %vm493_vm11 = vcmp.eq.s32.totalorder %v475_v49, %v1426_v34 }
  0xc9   : > { %986 = vst [vmem:[%s1451_s28 + $0x10] sm:$0xff] %v958_v60   ;;  %441 = vadd.xlane.f32.xlu1 %v894_v61  ;;  %v1471_v15 = vpop.xlane.xlu1 %355  ;;  %v509_v54 = vsel %vm493_vm11, %v1395_v22, 0.0 }
  0xca   : > { %v213_v62 = vpop.trf.xlu0 }
  0xcb   : > { %vm389_vm12 = vcmp.ne.f32.partialorder %v213_v62, 0.0 }
  0xcc   : > { %v895_v63 = vsel %vm389_vm12, 1.0, %v1204_v2  ;;  %vm494_vm12 = vcmp.eq.s32.totalorder %v476_v50, %v1426_v34 }
  0xcd   : > { %443 = vadd.xlane.f32.xlu1 %v895_v63  ;;  %v1475_v25 = vpop.xlane.xlu1 %357  ;;  %v510_v55 = vsel %vm494_vm12, %v1401_v24, 0.0 }
  0xce   : > { %v214_v0 = vpop.trf.xlu0 }
  0xcf   : > { %v963_v1 = vpack.c.bf16 %v214_v0, %v213_v62  ;;  %vm390_vm13 = vcmp.ne.f32.partialorder %v214_v0, 0.0 }
  0xd0   : > { %v896_v3 = vsel %vm390_vm13, 1.0, %v1204_v2  ;;  %vm495_vm13 = vcmp.eq.s32.totalorder %v477_v14, %v1426_v34 }
  0xd1   : > { %987 = vst [vmem:[%s1451_s28 + $0x18] sm:$0xff] %v963_v1   ;;  %445 = vadd.xlane.f32.xlu1 %v896_v3  ;;  %v1480_v36 = vpop.xlane.xlu1 %359  ;;  %v511_v20 = vsel %vm495_vm13, %v1407_v26, 0.0 }
  0xd2   : > { %v215_v5 = vpop.trf.xlu0 }
  0xd3   : > { %vm391_vm14 = vcmp.ne.f32.partialorder %v215_v5, 0.0 }
  0xd4   : > { %v897_v6 = vsel %vm391_vm14, 1.0, %v1204_v2  ;;  %vm496_vm14 = vcmp.eq.s32.totalorder %v478_v16, %v1426_v34 }
  0xd5   : > { %447 = vadd.xlane.f32.xlu1 %v897_v6  ;;  %v1490_v43 = vpop.xlane.xlu1 %361  ;;  %v512_v57 = vsel %vm496_vm14, %v1413_v28, 0.0 }
  0xd6   : > { %v216_v7 = vpop.trf.xlu0 }
  0xd7   : > { %v968_v9 = vpack.c.bf16 %v216_v7, %v215_v5  ;;  %vm392_vm15 = vcmp.ne.f32.partialorder %v216_v7, 0.0 }
  0xd8   : > { %v898_v10 = vsel %vm392_vm15, 1.0, %v1204_v2  ;;  %vm497_vm15 = vcmp.eq.s32.totalorder %v479_v18, %v1426_v34 }
  0xd9   : > { %988 = vst [vmem:[%s1451_s28 + $0x20] sm:$0xff] %v968_v9   ;;  %449 = vadd.xlane.f32.xlu1 %v898_v10  ;;  %v1502_v51 = vpop.xlane.xlu1 %363  ;;  %v513_v24 = vsel %vm497_vm15, %v1419_v31, 0.0 }
  0xda   : > { %v217_v11 = vpop.trf.xlu0 }
  0xdb   : > { %vm393_vm0 = vcmp.ne.f32.partialorder %v217_v11, 0.0 }
  0xdc   : > { %v899_v13 = vsel %vm393_vm0, 1.0, %v1204_v2 }
  0xdd   : > { %451 = vadd.xlane.f32.xlu1 %v899_v13  ;;  %v1512_v56 = vpop.xlane.xlu1 %365 }
  0xde   : > { %v218_v17 = vpop.trf.xlu0 }
  0xdf   : > { %v973_v19 = vpack.c.bf16 %v218_v17, %v217_v11  ;;  %vm394_vm1 = vcmp.ne.f32.partialorder %v218_v17, 0.0 }
  0xe0   : > { %v900_v21 = vsel %vm394_vm1, 1.0, %v1204_v2 }
  0xe1   : > { %989 = vst [vmem:[%s1451_s28 + $0x28] sm:$0xff] %v973_v19   ;;  %453 = vadd.xlane.f32.xlu1 %v900_v21  ;;  %v1520_v22 = vpop.xlane.xlu1 %367 }
  0xe2   : > { %v219_v23 = vpop.trf.xlu0 }
  0xe3   : > { %vm395_vm2 = vcmp.ne.f32.partialorder %v219_v23, 0.0 }
  0xe4   : > { %v901_v27 = vsel %vm395_vm2, 1.0, %v1204_v2 }
  0xe5   : > { %455 = vadd.xlane.f32.xlu1 %v901_v27  ;;  %v1523_v58 = vpop.xlane.xlu1 %369 }
  0xe6   : > { %v220_v29 = vpop.trf.xlu0 }
  0xe7   : > { %v978_v30 = vpack.c.bf16 %v220_v29, %v219_v23  ;;  %vm396_vm3 = vcmp.ne.f32.partialorder %v220_v29, 0.0 }
  0xe8   : > { %v902_v35 = vsel %vm396_vm3, 1.0, %v1204_v2 }
  0xe9   : > { %990 = vst [vmem:[%s1451_s28 + $0x30] sm:$0xff] %v978_v30   ;;  %457 = vadd.xlane.f32.xlu0 %v902_v35  ;;  %v1526_v33 = vpop.xlane.xlu1 %371 }
  0xea   : > { %v221_v37 = vpop.trf.xlu0 }
  0xeb   : > { %vm397_vm4 = vcmp.ne.f32.partialorder %v221_v37, 0.0 }
  0xec   : > { %v903_v40 = vsel %vm397_vm4, 1.0, %v1204_v2 }
  0xed   : > { %459 = vadd.xlane.f32.xlu1 %v903_v40 }
  0xee   : > { %v222_v41 = vpop.trf.xlu0 }
  0xef   : > { %v983_v44 = vpack.c.bf16 %v222_v41, %v221_v37  ;;  %vm398_vm8 = vcmp.ne.f32.partialorder %v222_v41, 0.0 }
  0xf0   : > { %v904_v47 = vsel %vm398_vm8, 1.0, %v1204_v2 }
  0xf1   : > { %991 = vst [vmem:[%s1451_s28 + $0x38] sm:$0xff] %v983_v44   ;;  %461 = vadd.xlane.f32.xlu0 %v904_v47  ;;  %526 = vadd.xlane.f32.xlu1 %v504_v42 }
  0xf5   : > { %528 = vadd.xlane.f32.xlu0 %v505_v48  ;;  %530 = vadd.xlane.f32.xlu1 %v506_v12 }
  0xf9   : > { %532 = vadd.xlane.f32.xlu0 %v507_v52  ;;  %534 = vadd.xlane.f32.xlu1 %v508_v53 }
  0xfd   : > { %536 = vadd.xlane.f32.xlu0 %v509_v54  ;;  %538 = vadd.xlane.f32.xlu1 %v510_v55 }
 0x101   : > { %540 = vadd.xlane.f32.xlu0 %v511_v20  ;;  %542 = vadd.xlane.f32.xlu1 %v512_v57 }
 0x105   : > { %544 = vadd.xlane.f32.xlu0 %v513_v24 }
 0x106   : > { %1148 = shalt.err (!%p1145_p10)
}
 0x107   : > { %s1149_s24 = scalar_lea.hbm %s1534_s8, 1024  ;;  %s1153_s29 = scalar_lea.hbm %s1759_s1, 2048 }
 0x108   : > { %p1150_p0 = scmp.ne.s32.totalorder %s1534_s8, %s1149_s24  ;;  %p1154_p1 = scmp.lt.s32.totalorder %s1534_s8, %s1759_s1 }
 0x109   : > { %p1155_p3 = scmp.lt.s32.totalorder %s1153_s29, %s1149_s24 }
 0x10a   : > { %p1151_p2 = pnand %p1150_p0, %p1769_p12 }
 0x10b   : > { %p1156_p6 = por %p1155_p3, %p1154_p1 }
 0x10c   : > { %p1152_p9 = pneg %p1151_p2 }
 0x10e   : > { %p1157_p11 = pnand %p1156_p6, %p1152_p9 }
 0x110   : > { %1160 = shalt.err (!%p1157_p11)
}
 0x111   : > { %s1206_s20 = smov 64   ;;  %s1207_s28 = smov 4   ;;  %v1559_v26 = vpop.xlane.xlu1 %373  ;;  %v546_v1 = vmax.f32 %v1462_v4, 1.0  ;;  %v547_v7 = vmax.f32 %v1466_v8, 1.0  ;;  %v548_v11 = vmax.f32 %v1471_v15, 1.0  ;;  %v549_v4 = vmax.f32 %v1475_v25, 1.0 }
 0x112   : > { %994 = dma.vmem_to_hbm [thread:$0]  (%p1769_p12), %s1528_s30, 1024, %s1534_s8, %s727_s14, %s1206_s20, %s1206_s20, %s1207_s28   ;;  %v550_v8 = vmax.f32 %v1480_v36, 1.0  ;;  %vm658_vm0 = vcmask 7168   ;;  %vm675_vm2 = vcmask 15360   ;;  %vm692_vm3 = vcmask 23552  }
 0x113   : > { %1043 = vrsqrt.f32 %v546_v1  ;;  %p170_p12 = scmp.lt.s32.totalorder %s1244_s13, 1  ;;  %vm709_vm4 = vcmask 31744   ;;  %v551_v32 = vmax.f32 %v1490_v43, 1.0 }
 0x115   : > { %v1561_v28 = vpop.xlane.xlu1 %375  ;;  %s1777_s13 = smov (!%p170_p12, %s1244_s13), 1 }
 0x116   : > { %s927_s21 = sshll.u32 %s1777_s13, 7 }
 0x117   : > { %s1587_s3 = scalar_lea.vmem %s1760_s2, %s927_s21 }
 0x119   : > { %v1563_v31 = vpop.xlane.xlu1 %377 }
 0x11d   : > { %v1565_v34 = vpop.xlane.xlu1 %379 }
 0x120   : > { %v1044_v23 = vpop.eup %1043 }
 0x121   : > { %v1567_v59 = vpop.xlane.xlu1 %381 }
 0x125   : > { %v515_v61 = vpop.xlane.xlu1 %514 }
 0x128   : > { %v517_v60 = vpop.xlane.xlu0 %516 }
 0x129   : > { %v1571_v63 = vpop.xlane.xlu1 %518 }
 0x12c   : > { %v1569_v62 = vpop.xlane.xlu0 %520 }
 0x12d   : > { %v1576_v3 = vpop.xlane.xlu1 %522 }
 0x130   : > { %v1573_v0 = vpop.xlane.xlu0 %524 }
 0x13e   : > { %v432_v5 = vpop.xlane.xlu0 %431 }
 0x13f   : > { %v578_v6 = vmax.f32 %v432_v5, 1.0  ;;  %vm610_vm1 = vcmp.gt.f32.partialorder %v432_v5, 0.0 }
 0x140   : > { %v905_v25 = vsel %vm610_vm1, 1.0, %v1204_v2 }
 0x141   : > { %1045 = vrsqrt.f32 %v578_v6 }
 0x142   : > { %v434_v9 = vpop.xlane.xlu1 %433  ;;  %1047 = vrsqrt.f32 %v547_v7 }
 0x143   : > { %v579_v10 = vmax.f32 %v434_v9, 1.0  ;;  %vm611_vm5 = vcmp.gt.f32.partialorder %v434_v9, 0.0 }
 0x144   : > { %v906_v40 = vsel %vm611_vm5, 1.0, %v1204_v2 }
 0x145   : > { %1049 = vrsqrt.f32 %v579_v10 }
 0x146   : > { %v436_v13 = vpop.xlane.xlu1 %435  ;;  %1051 = vrsqrt.f32 %v548_v11 }
 0x147   : > { %v580_v17 = vmax.f32 %v436_v13, 1.0  ;;  %vm612_vm6 = vcmp.gt.f32.partialorder %v436_v13, 0.0  ;;  %v552_v13 = vmax.f32 %v1502_v51, 1.0 }
 0x148   : > { %v907_v48 = vsel %vm612_vm6, 1.0, %v1204_v2 }
 0x149   : > { %1053 = vrsqrt.f32 %v580_v17 }
 0x14a   : > { %v438_v19 = vpop.xlane.xlu1 %437  ;;  %1055 = vrsqrt.f32 %v549_v4 }
 0x14b   : > { %v581_v21 = vmax.f32 %v438_v19, 1.0  ;;  %vm613_vm7 = vcmp.gt.f32.partialorder %v438_v19, 0.0 }
 0x14c   : > { %v908_v16 = vsel %vm613_vm7, 1.0, %v1204_v2 }
 0x14d   : > { %1057 = vrsqrt.f32 %v581_v21  ;;  %v553_v21 = vmax.f32 %v1512_v56, 1.0 }
 0x14e   : > { %v1046_v15 = vpop.eup %1045  ;;  %v440_v27 = vpop.xlane.xlu1 %439  ;;  %1059 = vrsqrt.f32 %v550_v8  ;;  %v554_v8 = vmax.f32 %v1520_v22, 1.0 }
 0x14f   : > { %v659_v29 = vsel %vm658_vm0, %v1044_v23, %v1046_v15  ;;  %v582_v30 = vmax.f32 %v440_v27, 1.0  ;;  %v1048_v36 = vpop.eup %1047  ;;  %vm614_vm8 = vcmp.gt.f32.partialorder %v440_v27, 0.0  ;;  %v555_v15 = vmax.f32 %v1523_v58, 1.0 }
 0x150   : > { %v676_v35 = vsel %vm675_vm2, %v659_v29, %v905_v25  ;;  %v556_v27 = vmax.f32 %v1526_v33, 1.0  ;;  %v557_v29 = vmax.f32 %v1559_v26, 1.0 }
 0x151   : > { %v693_v37 = vsel %vm692_vm3, %v676_v35, %v515_v61  ;;  %1061 = vrsqrt.f32 %v582_v30  ;;  %v558_v30 = vmax.f32 %v1561_v28, 1.0 }
 0x152   : > { %v1050_v38 = vpop.eup %1049  ;;  %710 = vst.msk [vmem:[%s1587_s3] sm:$0xff] %vm709_vm4, %v693_v37  ;;  %v442_v39 = vpop.xlane.xlu1 %441  ;;  %1063 = vrsqrt.f32 %v551_v32  ;;  %v559_v32 = vmax.f32 %v1563_v31, 1.0 }
 0x153   : > { %v660_v41 = vsel %vm658_vm0, %v1048_v36, %v1050_v38  ;;  %v583_v42 = vmax.f32 %v442_v39, 1.0  ;;  %v1052_v44 = vpop.eup %1051  ;;  %vm615_vm9 = vcmp.gt.f32.partialorder %v442_v39, 0.0  ;;  %v560_v36 = vmax.f32 %v1565_v34, 1.0 }
 0x154   : > { %v677_v43 = vsel %vm675_vm2, %v660_v41, %v906_v40  ;;  %v910_v7 = vsel %vm615_vm9, 1.0, %v1204_v2  ;;  %v561_v40 = vmax.f32 %v1567_v59, 1.0 }
 0x155   : > { %v694_v45 = vsel %vm692_vm3, %v677_v43, %v517_v60  ;;  %1065 = vrsqrt.f32 %v583_v42  ;;  %v909_v60 = vsel %vm614_vm8, 1.0, %v1204_v2 }
 0x156   : > { %v1054_v46 = vpop.eup %1053  ;;  %711 = vst.msk [vmem:[%s1587_s3 + $0x8] sm:$0xff] %vm709_vm4, %v694_v45  ;;  %v1602_v47 = vpop.xlane.xlu1 %443 }
 0x157   : > { %v661_v12 = vsel %vm658_vm0, %v1052_v44, %v1054_v46  ;;  %v1056_v50 = vpop.eup %1055  ;;  %v584_v10 = vmax.f32 %v1602_v47, 1.0  ;;  %vm616_vm10 = vcmp.gt.f32.partialorder %v1602_v47, 0.0 }
 0x158   : > { %v678_v49 = vsel %vm675_vm2, %v661_v12, %v907_v48  ;;  %v911_v34 = vsel %vm616_vm10, 1.0, %v1204_v2 }
 0x159   : > { %v695_v52 = vsel %vm692_vm3, %v678_v49, %v1571_v63  ;;  %1067 = vrsqrt.f32 %v584_v10 }
 0x15a   : > { %v1058_v53 = vpop.eup %1057  ;;  %712 = vst.msk [vmem:[%s1587_s3 + $0x10] sm:$0xff] %vm709_vm4, %v695_v52  ;;  %v1611_v14 = vpop.xlane.xlu1 %445  ;;  %1069 = vrsqrt.f32 %v552_v13 }
 0x15b   : > { %v662_v54 = vsel %vm658_vm0, %v1056_v50, %v1058_v53  ;;  %v1060_v18 = vpop.eup %1059  ;;  %vm617_vm11 = vcmp.gt.f32.partialorder %v1611_v14, 0.0 }
 0x15c   : > { %v679_v55 = vsel %vm675_vm2, %v662_v54, %v908_v16  ;;  %v912_v52 = vsel %vm617_vm11, 1.0, %v1204_v2 }
 0x15d   : > { %v696_v20 = vsel %vm692_vm3, %v679_v55, %v1569_v62 }
 0x15e   : > { %v1062_v57 = vpop.eup %1061  ;;  %713 = vst.msk [vmem:[%s1587_s3 + $0x18] sm:$0xff] %vm709_vm4, %v696_v20  ;;  %v1620_v24 = vpop.xlane.xlu1 %447 }
 0x15f   : > { %v663_v61 = vsel %vm658_vm0, %v1060_v18, %v1062_v57  ;;  %v1064_v1 = vpop.eup %1063  ;;  %v586_v19 = vmax.f32 %v1620_v24, 1.0  ;;  %vm618_vm12 = vcmp.gt.f32.partialorder %v1620_v24, 0.0 }
 0x160   : > { %v680_v63 = vsel %vm675_vm2, %v663_v61, %v909_v60  ;;  %v913_v53 = vsel %vm618_vm12, 1.0, %v1204_v2 }
 0x161   : > { %v697_v5 = vsel %vm692_vm3, %v680_v63, %v1576_v3  ;;  %v585_v3 = vmax.f32 %v1611_v14, 1.0 }
 0x162   : > { %v1066_v6 = vpop.eup %1065  ;;  %714 = vst.msk [vmem:[%s1587_s3 + $0x20] sm:$0xff] %vm709_vm4, %v697_v5  ;;  %v1629_v62 = vpop.xlane.xlu1 %449 }
 0x163   : > { %v664_v9 = vsel %vm658_vm0, %v1064_v1, %v1066_v6  ;;  %1071 = vrsqrt.f32 %v585_v3  ;;  %v587_v51 = vmax.f32 %v1629_v62, 1.0  ;;  %vm619_vm13 = vcmp.gt.f32.partialorder %v1629_v62, 0.0 }
 0x164   : > { %v681_v11 = vsel %vm675_vm2, %v664_v9, %v910_v7  ;;  %1073 = vrsqrt.f32 %v586_v19  ;;  %v914_v5 = vsel %vm619_vm13, 1.0, %v1204_v2 }
 0x165   : > { %v698_v17 = vsel %vm692_vm3, %v681_v11, %v1573_v0  ;;  %1075 = vrsqrt.f32 %v553_v21 }
 0x166   : > { %715 = vst.msk [vmem:[%s1587_s3 + $0x28] sm:$0xff] %vm709_vm4, %v698_v17  ;;  %v1641_v4 = vpop.xlane.xlu1 %451  ;;  %1077 = vrsqrt.f32 %v554_v8  ;;  %v1068_v35 = vpop.eup %1067 }
 0x167   : > { %v588_v0 = vmax.f32 %v1641_v4, 1.0  ;;  %1079 = vrsqrt.f32 %v587_v51  ;;  %v1070_v37 = vpop.eup %1069  ;;  %vm620_vm14 = vcmp.gt.f32.partialorder %v1641_v4, 0.0 }
 0x168   : > { %v665_v38 = vsel %vm658_vm0, %v1070_v37, %v1068_v35  ;;  %v915_v6 = vsel %vm620_vm14, 1.0, %v1204_v2 }
 0x169   : > { %1081 = vrsqrt.f32 %v588_v0  ;;  %v682_v44 = vsel %vm675_vm2, %v665_v38, %v911_v34 }
 0x16a   : > { %v1647_v23 = vpop.xlane.xlu1 %453  ;;  %1083 = vrsqrt.f32 %v555_v15 }
 0x16b   : > { %v589_v56 = vmax.f32 %v1647_v23, 1.0  ;;  %1085 = vrsqrt.f32 %v556_v27  ;;  %vm621_vm15 = vcmp.gt.f32.partialorder %v1647_v23, 0.0 }
 0x16c   : > { %v916_v51 = vsel %vm621_vm15, 1.0, %v1204_v2 }
 0x16d   : > { %1087 = vrsqrt.f32 %v589_v56 }
 0x16e   : > { %v1653_v25 = vpop.xlane.xlu1 %455 }
 0x16f   : > { %v590_v22 = vmax.f32 %v1653_v25, 1.0  ;;  %vm622_vm1 = vcmp.gt.f32.partialorder %v1653_v25, 0.0 }
 0x170   : > { %v1072_v28 = vpop.eup %1071  ;;  %v917_v23 = vsel %vm622_vm1, 1.0, %v1204_v2 }
 0x171   : > { %1089 = vrsqrt.f32 %v590_v22  ;;  %v1074_v39 = vpop.eup %1073 }
 0x172   : > { %v1659_v58 = vpop.xlane.xlu0 %457  ;;  %1091 = vrsqrt.f32 %v557_v29  ;;  %v1076_v41 = vpop.eup %1075 }
 0x173   : > { %v591_v33 = vmax.f32 %v1659_v58, 1.0  ;;  %1093 = vrsqrt.f32 %v558_v30  ;;  %v1078_v42 = vpop.eup %1077  ;;  %v666_v48 = vsel %vm658_vm0, %v1076_v41, %v1072_v28  ;;  %vm623_vm5 = vcmp.gt.f32.partialorder %v1659_v58, 0.0 }
 0x174   : > { %1095 = vrsqrt.f32 %v559_v32  ;;  %v1080_v46 = vpop.eup %1079  ;;  %v667_v12 = vsel %vm658_vm0, %v1078_v42, %v1074_v39  ;;  %v683_v54 = vsel %vm675_vm2, %v666_v48, %v912_v52 }
 0x175   : > { %1097 = vrsqrt.f32 %v591_v33  ;;  %v684_v55 = vsel %vm675_vm2, %v667_v12, %v913_v53  ;;  %v918_v33 = vsel %vm623_vm5, 1.0, %v1204_v2 }
 0x176   : > { %v1664_v26 = vpop.xlane.xlu1 %459  ;;  %1099 = vrsqrt.f32 %v560_v36  ;;  %v1082_v49 = vpop.eup %1081 }
 0x177   : > { %v592_v31 = vmax.f32 %v1664_v26, 1.0  ;;  %v1084_v50 = vpop.eup %1083  ;;  %vm624_vm6 = vcmp.gt.f32.partialorder %v1664_v26, 0.0 }
 0x178   : > { %v1086_v14 = vpop.eup %1085  ;;  %v668_v60 = vsel %vm658_vm0, %v1084_v50, %v1080_v46  ;;  %v919_v35 = vsel %vm624_vm6, 1.0, %v1204_v2 }
 0x179   : > { %1101 = vrsqrt.f32 %v592_v31  ;;  %v669_v61 = vsel %vm658_vm0, %v1086_v14, %v1082_v49  ;;  %v685_v9 = vsel %vm675_vm2, %v668_v60, %v914_v5 }
 0x17a   : > { %v1672_v43 = vpop.xlane.xlu0 %461  ;;  %v527_v45 = vpop.xlane.xlu1 %526  ;;  %1103 = vrsqrt.f32 %v561_v40  ;;  %v686_v10 = vsel %vm675_vm2, %v669_v61, %v915_v6 }
 0x17b   : > { %v593_v47 = vmax.f32 %v1672_v43, 1.0  ;;  %v699_v59 = vsel %vm692_vm3, %v682_v44, %v527_v45  ;;  %v1088_v20 = vpop.eup %1087  ;;  %vm625_vm7 = vcmp.gt.f32.partialorder %v1672_v43, 0.0 }
 0x17c   : > { %716 = vst.msk [vmem:[%s1587_s3 + $0x30] sm:$0xff] %vm709_vm4, %v699_v59  ;;  %v920_v41 = vsel %vm625_vm7, 1.0, %v1204_v2 }
 0x17d   : > { %1105 = vrsqrt.f32 %v593_v47 }
 0x17e   : > { %v529_v16 = vpop.xlane.xlu0 %528  ;;  %v531_v18 = vpop.xlane.xlu1 %530 }
 0x17f   : > { %v700_v57 = vsel %vm692_vm3, %v683_v54, %v529_v16  ;;  %v701_v24 = vsel %vm692_vm3, %v684_v55, %v531_v18  ;;  %v1090_v63 = vpop.eup %1089 }
 0x180   : > { %717 = vst.msk [vmem:[%s1587_s3 + $0x38] sm:$0xff] %vm709_vm4, %v700_v57  ;;  %718 = vst.msk [vmem:[%s1587_s3 + $0x40] sm:$0xff] %vm709_vm4, %v701_v24  ;;  %v1092_v1 = vpop.eup %1091 }
 0x181   : > { %v1094_v62 = vpop.eup %1093  ;;  %v670_v4 = vsel %vm658_vm0, %v1092_v1, %v1088_v20 }
 0x182   : > { %v533_v7 = vpop.xlane.xlu0 %532  ;;  %v535_v11 = vpop.xlane.xlu1 %534  ;;  %v671_v19 = vsel %vm658_vm0, %v1094_v62, %v1090_v63  ;;  %v687_v27 = vsel %vm675_vm2, %v670_v4, %v916_v51 }
 0x183   : > { %v1096_v13 = vpop.eup %1095  ;;  %v702_v17 = vsel %vm692_vm3, %v685_v9, %v533_v7  ;;  %v703_v3 = vsel %vm692_vm3, %v686_v10, %v535_v11  ;;  %v688_v56 = vsel %vm675_vm2, %v671_v19, %v917_v23 }
 0x184   : > { %v1098_v21 = vpop.eup %1097  ;;  %719 = vst.msk [vmem:[%s1587_s3 + $0x48] sm:$0xff] %vm709_vm4, %v702_v17  ;;  %720 = vst.msk [vmem:[%s1587_s3 + $0x50] sm:$0xff] %vm709_vm4, %v703_v3 }
 0x185   : > { %v1100_v8 = vpop.eup %1099  ;;  %v672_v30 = vsel %vm658_vm0, %v1096_v13, %v1098_v21 }
 0x186   : > { %v1102_v0 = vpop.eup %1101  ;;  %v537_v15 = vpop.xlane.xlu0 %536  ;;  %v689_v26 = vsel %vm675_vm2, %v672_v30, %v918_v33 }
 0x187   : > { %v539_v25 = vpop.xlane.xlu1 %538  ;;  %v704_v22 = vsel %vm692_vm3, %v687_v27, %v537_v15  ;;  %v673_v32 = vsel %vm658_vm0, %v1100_v8, %v1102_v0  ;;  %v1104_v58 = vpop.eup %1103 }
 0x188   : > { %v705_v29 = vsel %vm692_vm3, %v688_v56, %v539_v25  ;;  %721 = vst.msk [vmem:[%s1587_s3 + $0x58] sm:$0xff] %vm709_vm4, %v704_v22  ;;  %v690_v28 = vsel %vm675_vm2, %v673_v32, %v919_v35 }
 0x189   : > { %722 = vst.msk [vmem:[%s1587_s3 + $0x60] sm:$0xff] %vm709_vm4, %v705_v29 }
 0x18a   : > { %v1106_v36 = vpop.eup %1105  ;;  %v541_v37 = vpop.xlane.xlu0 %540 }
 0x18b   : > { %v543_v31 = vpop.xlane.xlu1 %542  ;;  %v706_v38 = vsel %vm692_vm3, %v689_v26, %v541_v37  ;;  %v674_v40 = vsel %vm658_vm0, %v1104_v58, %v1106_v36 }
 0x18c   : > { %v707_v39 = vsel %vm692_vm3, %v690_v28, %v543_v31  ;;  %723 = vst.msk [vmem:[%s1587_s3 + $0x68] sm:$0xff] %vm709_vm4, %v706_v38  ;;  %v691_v42 = vsel %vm675_vm2, %v674_v40, %v920_v41 }
 0x18d   : > { %724 = vst.msk [vmem:[%s1587_s3 + $0x70] sm:$0xff] %vm709_vm4, %v707_v39 }
 0x18e   : > { %v545_v34 = vpop.xlane.xlu0 %544 }
 0x18f   : > { %v708_v43 = vsel %vm692_vm3, %v691_v42, %v545_v34 }
 0x190   : > { %725 = vst.msk [vmem:[%s1587_s3 + $0x78] sm:$0xff] %vm709_vm4, %v708_v43 }
 0x191 PF: > { %s763_s13 = sand.u32 1, %s1187_s9   ;;  %p1770_p13 = scmp.ne.s32.totalorder %s1766_s22, 0 }
 0x192   : > { %p1771_p4 = scmp.ge.s32.totalorder %s1199_s12, 2  ;;  %s764_s4 = scalar_lea.sflag [#allocation4], %s763_s13 }
 0x194   : > { %p1001_p5 = pnand %p1771_p4, %p1770_p13 }
 0x196   : > { %p1002_p7 = pneg %p1001_p5 }
 0x198   : > { %1182 = dma.done.wait (%p1002_p7), %s764_s4, 1024  }
 0x199   : > { %1184 = vsyncadd (%p1002_p7), %s764_s4, 4294966272  ;;  %p16_p8 = scmp.ge.s32.totalorder %s1248_s15, 4   ;;  %s1772_s9 = smov %s1191_s10 }
 0x19a   : > { %s1773_s10 = smov %s1195_s11  ;;  %s1774_s11 = smov %s1260_s18 }
 0x19b   : > { %s1775_s12 = smov %s1248_s15  ;;  %18 = sbr.rel (!%p16_p8) target bundleno = 5 (0x5), region = 81 }
 0x1a0   :  { %777 = vsyncpa [#allocation3], 1 }
 0x1a1   :  { %779 = vsyncpa [#allocation3 + $0x1], 1 }
 0x1a2   :  { %780 = vsyncpa [#allocation4], 1 }
 0x1a3   :  { %782 = vsyncpa [#allocation4 + $0x1], 1 }

</bundles_post_ra>
